<compile_context>
chip_gen: v5e
topology: v5e:2x2
jax: 0.10.0
libtpu: 0.0.40
codegen_flags: <defaults>
</compile_context>

<pallas_src>
import functools

import jax
import jax.numpy as jnp
import numpy as np
from jax.experimental import pallas as pl
from jax.experimental.pallas import tpu as pltpu

C1 = 0.01 ** 2
C2 = 0.03 ** 2


def _ssim_kernel(x_ref, y_ref, m_ref, o_ref, *, chans):
    TB, H, WC = x_ref.shape
    W = WC // chans
    Ho, Wo = H - 2, W - 2
    WoC = Wo * chans

    x = x_ref[...].astype(jnp.float32)
    y = y_ref[...].astype(jnp.float32)
    m = m_ref[...].astype(jnp.float32)

    def hsum(a):
        # 1x3 horizontal sum along W on the fused (W*C) lane axis: shifts of
        # `chans` lanes (lowered to lane rotations on the XLU, not VALU).
        return (a[:, :, 0:WoC]
                + a[:, :, chans:chans + WoC]
                + a[:, :, 2 * chans:2 * chans + WoC])

    def vsum(b):
        # 3x1 vertical sum along H (sublane axis).
        return b[:, 0:Ho, :] + b[:, 1:1 + Ho, :] + b[:, 2:2 + Ho, :]

    def pool3(a):
        # Separable 3x3 average pool, stride 1, valid.
        return vsum(hsum(a)) * (1.0 / 9.0)

    mu_x = pool3(x)
    mu_y = pool3(y)
    sigma_x = pool3(x * x) - mu_x * mu_x
    sigma_y = pool3(y * y) - mu_y * mu_y
    sigma_xy = pool3(x * y) - mu_x * mu_y

    ssim_n = (2.0 * mu_x * mu_y + C1) * (2.0 * sigma_xy + C2)
    ssim_d = (mu_x * mu_x + mu_y * mu_y + C1) * (sigma_x + sigma_y + C2)
    ssim_mask = pool3(m)

    # Exact reciprocal keeps the 1e-5 tolerance vs. the reference; switch to
    # approx=True (EUP vrcp, free bundle slot) if downstream tolerates ~bf16
    # level error.
    inv_d = pl.reciprocal(ssim_d, approx=False)
    out = ssim_mask * jnp.clip((1.0 - ssim_n * inv_d) * 0.5, 0.0, 1.0)
    o_ref[...] = out.astype(o_ref.dtype)


def _pick_tb(N, H, W, C, in_bytes, budget_bytes=20 << 20):
    """Largest batch-block TB (divisor of N) fitting a conservative VMEM budget."""
    plane_in = H * W * C * in_bytes
    plane_out = (H - 2) * (W - 2) * C * 4
    plane_tmp = H * (W - 2) * C * 4
    # 2x double-buffered I/O blocks + ~8 f32 intermediate planes in the kernel.
    per_slice = 2 * (3 * plane_in + plane_out) + 8 * plane_tmp
    tb_max = max(1, budget_bytes // max(per_slice, 1))
    if N >= 2:
        # Keep the grid length >= 2 so v7x can shard it across its 2 TCs and
        # v5e/v6e still overlap DMA with compute across steps.
        tb_max = min(tb_max, max(1, N // 2))
    tb = 1
    for d in range(1, min(int(tb_max), N) + 1):
        if N % d == 0:
            tb = d
    return tb


def ssim_pallas(x, y, mask):
    """x, y, mask: NHWC arrays. Returns NHWC float32 of shape (N, H-2, W-2, C)."""
    N, H, W, C = x.shape
    Ho, Wo = H - 2, W - 2

    # Free relayout: NHWC -> (N, H, W*C); no transpose, no extra HBM traffic.
    xt = x.reshape(N, H, W * C)
    yt = y.reshape(N, H, W * C)
    mt = mask.reshape(N, H, W * C)

    in_bytes = jnp.dtype(x.dtype).itemsize
    TB = _pick_tb(N, H, W, C, in_bytes)
    grid = (N // TB,)

    in_spec = pl.BlockSpec((TB, H, W * C), lambda i: (i, 0, 0))
    out_spec = pl.BlockSpec((TB, Ho, Wo * C), lambda i: (i, 0, 0))

    out = pl.pallas_call(
        functools.partial(_ssim_kernel, chans=C),
        out_shape=jax.ShapeDtypeStruct((N, Ho, Wo * C), jnp.float32),
        grid_spec=pltpu.PrefetchScalarGridSpec(
            num_scalar_prefetch=0,
            grid=grid,
            in_specs=[in_spec, in_spec, in_spec],
            out_specs=out_spec,
        ),
        compiler_params=pltpu.CompilerParams(
            dimension_semantics=("parallel",),
            vmem_limit_bytes=32 << 20,  # safe on v5e/v6e (128 MiB) and v7x (64 MiB)
        ),
    )(xt, yt, mt)

    # Free relayout back: (N, Ho, Wo*C) -> NHWC.
    return out.reshape(N, Ho, Wo, C)


def ssim_reference(x, y, mask):
    """Pure-JAX reference mirroring the PyTorch module (NHWC in, NHWC out)."""
    def avgpool3(a_nchw):
        N, Ch, H, W = a_nchw.shape
        Ho, Wo = H - 2, W - 2
        s = jnp.zeros((N, Ch, Ho, Wo), jnp.float32)
        for di in range(3):
            for dj in range(3):
                s = s + a_nchw[:, :, di:di + Ho, dj:dj + Wo]
        return s / 9.0

    xt = jnp.transpose(x, (0, 3, 1, 2)).astype(jnp.float32)
    yt = jnp.transpose(y, (0, 3, 1, 2)).astype(jnp.float32)
    mt = jnp.transpose(mask, (0, 3, 1, 2)).astype(jnp.float32)

    mu_x = avgpool3(xt)
    mu_y = avgpool3(yt)
    sigma_x = avgpool3(xt * xt) - mu_x ** 2
    sigma_y = avgpool3(yt * yt) - mu_y ** 2
    sigma_xy = avgpool3(xt * yt) - mu_x * mu_y
    ssim_n = (2 * mu_x * mu_y + C1) * (2 * sigma_xy + C2)
    ssim_d = (mu_x ** 2 + mu_y ** 2 + C1) * (sigma_x + sigma_y + C2)
    ssim_mask = avgpool3(mt)
    out = ssim_mask * jnp.clip((1 - ssim_n / ssim_d) / 2, 0.0, 1.0)
    return jnp.transpose(out, (0, 2, 3, 1))


if __name__ == "__main__":
    key = jax.random.PRNGKey(0)
    kx, ky, km = jax.random.split(key, 3)

    N, H, W, C = 2, 16, 16, 4
    x = jax.random.uniform(kx, (N, H, W, C), dtype=jnp.float32)
    y = jax.random.uniform(ky, (N, H, W, C), dtype=jnp.float32)
    mask = (jax.random.uniform(km, (N, H, W, C)) > 0.3).astype(jnp.float32)

    out = ssim_pallas(x, y, mask)
    out = jax.block_until_ready(out)

    ref = jax.block_until_ready(ssim_reference(x, y, mask))
    assert out.shape == (N, H - 2, W - 2, C), out.shape
    np.testing.assert_allclose(np.asarray(out), np.asarray(ref), rtol=1e-5, atol=1e-5)

    print("KERNEL_OK")
</pallas_src>

<mosaic_0001>
module attributes {stable_mosaic.version = 11 : i64} {
  func.func @_ssim_kernel(%arg0: i32, %arg1: memref<1x16x64xf32, #tpu.memory_space<vmem>>, %arg2: memref<1x16x64xf32, #tpu.memory_space<vmem>>, %arg3: memref<1x16x64xf32, #tpu.memory_space<vmem>>, %arg4: memref<1x14x56xf32, #tpu.memory_space<vmem>>) attributes {dimension_semantics = [#tpu.dimension_semantics<parallel>], iteration_bounds = array<i64: 2>, scalar_prefetch = 0 : i64, scratch_operands = 0 : i64, tpu.core_type = #tpu.core_type<tc>, window_params = [{transform_indices = @transform_0, window_bounds = array<i64: 1, 16, 64>}, {transform_indices = @transform_1, window_bounds = array<i64: 1, 16, 64>}, {transform_indices = @transform_2, window_bounds = array<i64: 1, 16, 64>}, {transform_indices = @transform_3, window_bounds = array<i64: 1, 14, 56>}]} {
    %c0 = arith.constant 0 : index
    %c0_0 = arith.constant 0 : index
    %c0_1 = arith.constant 0 : index
    %0 = vector.load %arg1[%c0, %c0_0, %c0_1] : memref<1x16x64xf32, #tpu.memory_space<vmem>>, vector<1x16x64xf32>
    %c0_2 = arith.constant 0 : index
    %c0_3 = arith.constant 0 : index
    %c0_4 = arith.constant 0 : index
    %1 = vector.load %arg2[%c0_2, %c0_3, %c0_4] : memref<1x16x64xf32, #tpu.memory_space<vmem>>, vector<1x16x64xf32>
    %c0_5 = arith.constant 0 : index
    %c0_6 = arith.constant 0 : index
    %c0_7 = arith.constant 0 : index
    %2 = vector.load %arg3[%c0_5, %c0_6, %c0_7] : memref<1x16x64xf32, #tpu.memory_space<vmem>>, vector<1x16x64xf32>
    %3 = vector.extract_strided_slice %0 {offsets = [0, 0, 0], sizes = [1, 16, 56], strides = [1, 1, 1]} : vector<1x16x64xf32> to vector<1x16x56xf32>
    %4 = vector.extract_strided_slice %0 {offsets = [0, 0, 4], sizes = [1, 16, 56], strides = [1, 1, 1]} : vector<1x16x64xf32> to vector<1x16x56xf32>
    %5 = arith.addf %3, %4 : vector<1x16x56xf32>
    %6 = vector.extract_strided_slice %0 {offsets = [0, 0, 8], sizes = [1, 16, 56], strides = [1, 1, 1]} : vector<1x16x64xf32> to vector<1x16x56xf32>
    %7 = arith.addf %5, %6 : vector<1x16x56xf32>
    %8 = vector.extract_strided_slice %7 {offsets = [0, 0, 0], sizes = [1, 14, 56], strides = [1, 1, 1]} : vector<1x16x56xf32> to vector<1x14x56xf32>
    %9 = vector.extract_strided_slice %7 {offsets = [0, 1, 0], sizes = [1, 14, 56], strides = [1, 1, 1]} : vector<1x16x56xf32> to vector<1x14x56xf32>
    %10 = arith.addf %8, %9 : vector<1x14x56xf32>
    %11 = vector.extract_strided_slice %7 {offsets = [0, 2, 0], sizes = [1, 14, 56], strides = [1, 1, 1]} : vector<1x16x56xf32> to vector<1x14x56xf32>
    %12 = arith.addf %10, %11 : vector<1x14x56xf32>
    %cst = arith.constant 0.111111112 : f32
    %13 = vector.broadcast %cst : f32 to vector<1x14x56xf32>
    %14 = arith.mulf %12, %13 : vector<1x14x56xf32>
    %15 = vector.extract_strided_slice %1 {offsets = [0, 0, 0], sizes = [1, 16, 56], strides = [1, 1, 1]} : vector<1x16x64xf32> to vector<1x16x56xf32>
    %16 = vector.extract_strided_slice %1 {offsets = [0, 0, 4], sizes = [1, 16, 56], strides = [1, 1, 1]} : vector<1x16x64xf32> to vector<1x16x56xf32>
    %17 = arith.addf %15, %16 : vector<1x16x56xf32>
    %18 = vector.extract_strided_slice %1 {offsets = [0, 0, 8], sizes = [1, 16, 56], strides = [1, 1, 1]} : vector<1x16x64xf32> to vector<1x16x56xf32>
    %19 = arith.addf %17, %18 : vector<1x16x56xf32>
    %20 = vector.extract_strided_slice %19 {offsets = [0, 0, 0], sizes = [1, 14, 56], strides = [1, 1, 1]} : vector<1x16x56xf32> to vector<1x14x56xf32>
    %21 = vector.extract_strided_slice %19 {offsets = [0, 1, 0], sizes = [1, 14, 56], strides = [1, 1, 1]} : vector<1x16x56xf32> to vector<1x14x56xf32>
    %22 = arith.addf %20, %21 : vector<1x14x56xf32>
    %23 = vector.extract_strided_slice %19 {offsets = [0, 2, 0], sizes = [1, 14, 56], strides = [1, 1, 1]} : vector<1x16x56xf32> to vector<1x14x56xf32>
    %24 = arith.addf %22, %23 : vector<1x14x56xf32>
    %cst_8 = arith.constant 0.111111112 : f32
    %25 = vector.broadcast %cst_8 : f32 to vector<1x14x56xf32>
    %26 = arith.mulf %24, %25 : vector<1x14x56xf32>
    %27 = arith.mulf %0, %0 : vector<1x16x64xf32>
    %28 = vector.extract_strided_slice %27 {offsets = [0, 0, 0], sizes = [1, 16, 56], strides = [1, 1, 1]} : vector<1x16x64xf32> to vector<1x16x56xf32>
    %29 = vector.extract_strided_slice %27 {offsets = [0, 0, 4], sizes = [1, 16, 56], strides = [1, 1, 1]} : vector<1x16x64xf32> to vector<1x16x56xf32>
    %30 = arith.addf %28, %29 : vector<1x16x56xf32>
    %31 = vector.extract_strided_slice %27 {offsets = [0, 0, 8], sizes = [1, 16, 56], strides = [1, 1, 1]} : vector<1x16x64xf32> to vector<1x16x56xf32>
    %32 = arith.addf %30, %31 : vector<1x16x56xf32>
    %33 = vector.extract_strided_slice %32 {offsets = [0, 0, 0], sizes = [1, 14, 56], strides = [1, 1, 1]} : vector<1x16x56xf32> to vector<1x14x56xf32>
    %34 = vector.extract_strided_slice %32 {offsets = [0, 1, 0], sizes = [1, 14, 56], strides = [1, 1, 1]} : vector<1x16x56xf32> to vector<1x14x56xf32>
    %35 = arith.addf %33, %34 : vector<1x14x56xf32>
    %36 = vector.extract_strided_slice %32 {offsets = [0, 2, 0], sizes = [1, 14, 56], strides = [1, 1, 1]} : vector<1x16x56xf32> to vector<1x14x56xf32>
    %37 = arith.addf %35, %36 : vector<1x14x56xf32>
    %cst_9 = arith.constant 0.111111112 : f32
    %38 = vector.broadcast %cst_9 : f32 to vector<1x14x56xf32>
    %39 = arith.mulf %37, %38 : vector<1x14x56xf32>
    %40 = arith.mulf %14, %14 : vector<1x14x56xf32>
    %41 = arith.subf %39, %40 : vector<1x14x56xf32>
    %42 = arith.mulf %1, %1 : vector<1x16x64xf32>
    %43 = vector.extract_strided_slice %42 {offsets = [0, 0, 0], sizes = [1, 16, 56], strides = [1, 1, 1]} : vector<1x16x64xf32> to vector<1x16x56xf32>
    %44 = vector.extract_strided_slice %42 {offsets = [0, 0, 4], sizes = [1, 16, 56], strides = [1, 1, 1]} : vector<1x16x64xf32> to vector<1x16x56xf32>
    %45 = arith.addf %43, %44 : vector<1x16x56xf32>
    %46 = vector.extract_strided_slice %42 {offsets = [0, 0, 8], sizes = [1, 16, 56], strides = [1, 1, 1]} : vector<1x16x64xf32> to vector<1x16x56xf32>
    %47 = arith.addf %45, %46 : vector<1x16x56xf32>
    %48 = vector.extract_strided_slice %47 {offsets = [0, 0, 0], sizes = [1, 14, 56], strides = [1, 1, 1]} : vector<1x16x56xf32> to vector<1x14x56xf32>
    %49 = vector.extract_strided_slice %47 {offsets = [0, 1, 0], sizes = [1, 14, 56], strides = [1, 1, 1]} : vector<1x16x56xf32> to vector<1x14x56xf32>
    %50 = arith.addf %48, %49 : vector<1x14x56xf32>
    %51 = vector.extract_strided_slice %47 {offsets = [0, 2, 0], sizes = [1, 14, 56], strides = [1, 1, 1]} : vector<1x16x56xf32> to vector<1x14x56xf32>
    %52 = arith.addf %50, %51 : vector<1x14x56xf32>
    %cst_10 = arith.constant 0.111111112 : f32
    %53 = vector.broadcast %cst_10 : f32 to vector<1x14x56xf32>
    %54 = arith.mulf %52, %53 : vector<1x14x56xf32>
    %55 = arith.mulf %26, %26 : vector<1x14x56xf32>
    %56 = arith.subf %54, %55 : vector<1x14x56xf32>
    %57 = arith.mulf %0, %1 : vector<1x16x64xf32>
    %58 = vector.extract_strided_slice %57 {offsets = [0, 0, 0], sizes = [1, 16, 56], strides = [1, 1, 1]} : vector<1x16x64xf32> to vector<1x16x56xf32>
    %59 = vector.extract_strided_slice %57 {offsets = [0, 0, 4], sizes = [1, 16, 56], strides = [1, 1, 1]} : vector<1x16x64xf32> to vector<1x16x56xf32>
    %60 = arith.addf %58, %59 : vector<1x16x56xf32>
    %61 = vector.extract_strided_slice %57 {offsets = [0, 0, 8], sizes = [1, 16, 56], strides = [1, 1, 1]} : vector<1x16x64xf32> to vector<1x16x56xf32>
    %62 = arith.addf %60, %61 : vector<1x16x56xf32>
    %63 = vector.extract_strided_slice %62 {offsets = [0, 0, 0], sizes = [1, 14, 56], strides = [1, 1, 1]} : vector<1x16x56xf32> to vector<1x14x56xf32>
    %64 = vector.extract_strided_slice %62 {offsets = [0, 1, 0], sizes = [1, 14, 56], strides = [1, 1, 1]} : vector<1x16x56xf32> to vector<1x14x56xf32>
    %65 = arith.addf %63, %64 : vector<1x14x56xf32>
    %66 = vector.extract_strided_slice %62 {offsets = [0, 2, 0], sizes = [1, 14, 56], strides = [1, 1, 1]} : vector<1x16x56xf32> to vector<1x14x56xf32>
    %67 = arith.addf %65, %66 : vector<1x14x56xf32>
    %cst_11 = arith.constant 0.111111112 : f32
    %68 = vector.broadcast %cst_11 : f32 to vector<1x14x56xf32>
    %69 = arith.mulf %67, %68 : vector<1x14x56xf32>
    %70 = arith.mulf %14, %26 : vector<1x14x56xf32>
    %71 = arith.subf %69, %70 : vector<1x14x56xf32>
    %cst_12 = arith.constant 2.000000e+00 : f32
    %72 = vector.broadcast %cst_12 : f32 to vector<1x14x56xf32>
    %73 = arith.mulf %72, %14 : vector<1x14x56xf32>
    %74 = arith.mulf %73, %26 : vector<1x14x56xf32>
    %cst_13 = arith.constant 9.99999974E-5 : f32
    %75 = vector.broadcast %cst_13 : f32 to vector<1x14x56xf32>
    %76 = arith.addf %74, %75 : vector<1x14x56xf32>
    %cst_14 = arith.constant 2.000000e+00 : f32
    %77 = vector.broadcast %cst_14 : f32 to vector<1x14x56xf32>
    %78 = arith.mulf %77, %71 : vector<1x14x56xf32>
    %cst_15 = arith.constant 8.99999984E-4 : f32
    %79 = vector.broadcast %cst_15 : f32 to vector<1x14x56xf32>
    %80 = arith.addf %78, %79 : vector<1x14x56xf32>
    %81 = arith.mulf %76, %80 : vector<1x14x56xf32>
    %82 = arith.mulf %14, %14 : vector<1x14x56xf32>
    %83 = arith.mulf %26, %26 : vector<1x14x56xf32>
    %84 = arith.addf %82, %83 : vector<1x14x56xf32>
    %cst_16 = arith.constant 9.99999974E-5 : f32
    %85 = vector.broadcast %cst_16 : f32 to vector<1x14x56xf32>
    %86 = arith.addf %84, %85 : vector<1x14x56xf32>
    %87 = arith.addf %41, %56 : vector<1x14x56xf32>
    %cst_17 = arith.constant 8.99999984E-4 : f32
    %88 = vector.broadcast %cst_17 : f32 to vector<1x14x56xf32>
    %89 = arith.addf %87, %88 : vector<1x14x56xf32>
    %90 = arith.mulf %86, %89 : vector<1x14x56xf32>
    %91 = vector.extract_strided_slice %2 {offsets = [0, 0, 0], sizes = [1, 16, 56], strides = [1, 1, 1]} : vector<1x16x64xf32> to vector<1x16x56xf32>
    %92 = vector.extract_strided_slice %2 {offsets = [0, 0, 4], sizes = [1, 16, 56], strides = [1, 1, 1]} : vector<1x16x64xf32> to vector<1x16x56xf32>
    %93 = arith.addf %91, %92 : vector<1x16x56xf32>
    %94 = vector.extract_strided_slice %2 {offsets = [0, 0, 8], sizes = [1, 16, 56], strides = [1, 1, 1]} : vector<1x16x64xf32> to vector<1x16x56xf32>
    %95 = arith.addf %93, %94 : vector<1x16x56xf32>
    %96 = vector.extract_strided_slice %95 {offsets = [0, 0, 0], sizes = [1, 14, 56], strides = [1, 1, 1]} : vector<1x16x56xf32> to vector<1x14x56xf32>
    %97 = vector.extract_strided_slice %95 {offsets = [0, 1, 0], sizes = [1, 14, 56], strides = [1, 1, 1]} : vector<1x16x56xf32> to vector<1x14x56xf32>
    %98 = arith.addf %96, %97 : vector<1x14x56xf32>
    %99 = vector.extract_strided_slice %95 {offsets = [0, 2, 0], sizes = [1, 14, 56], strides = [1, 1, 1]} : vector<1x16x56xf32> to vector<1x14x56xf32>
    %100 = arith.addf %98, %99 : vector<1x14x56xf32>
    %cst_18 = arith.constant 0.111111112 : f32
    %101 = vector.broadcast %cst_18 : f32 to vector<1x14x56xf32>
    %102 = arith.mulf %100, %101 : vector<1x14x56xf32>
    %103 = tpu.reciprocal %90 : vector<1x14x56xf32> -> vector<1x14x56xf32>
    %104 = arith.mulf %81, %103 : vector<1x14x56xf32>
    %cst_19 = arith.constant 1.000000e+00 : f32
    %105 = vector.broadcast %cst_19 : f32 to vector<1x14x56xf32>
    %106 = arith.subf %105, %104 : vector<1x14x56xf32>
    %cst_20 = arith.constant 5.000000e-01 : f32
    %107 = vector.broadcast %cst_20 : f32 to vector<1x14x56xf32>
    %108 = arith.mulf %106, %107 : vector<1x14x56xf32>
    %cst_21 = arith.constant 0.000000e+00 : f32
    %cst_22 = arith.constant 1.000000e+00 : f32
    %109 = vector.broadcast %cst_21 : f32 to vector<1x14x56xf32>
    %110 = arith.maximumf %109, %108 : vector<1x14x56xf32>
    %111 = vector.broadcast %cst_22 : f32 to vector<1x14x56xf32>
    %112 = arith.minimumf %111, %110 : vector<1x14x56xf32>
    %113 = arith.mulf %102, %112 : vector<1x14x56xf32>
    %c0_23 = arith.constant 0 : index
    %c0_24 = arith.constant 0 : index
    %c0_25 = arith.constant 0 : index
    %114 = vector.load %arg4[%c0_23, %c0_24, %c0_25] : memref<1x14x56xf32, #tpu.memory_space<vmem>>, vector<1x14x56xf32>
    tpu.vector_store %arg4[%c0_23, %c0_24, %c0_25], %113 {strides = array<i32>} : memref<1x14x56xf32, #tpu.memory_space<vmem>>, vector<1x14x56xf32>,
    return
  }
  func.func @transform_0(%arg0: i32) -> (i32, i32, i32) {
    %c0_i32 = arith.constant 0 : i32
    %c0_i32_0 = arith.constant 0 : i32
    %c0_i32_1 = arith.constant 0 : i32
    return %arg0, %c0_i32, %c0_i32_0 : i32, i32, i32
  }
  func.func @transform_1(%arg0: i32) -> (i32, i32, i32) {
    %c0_i32 = arith.constant 0 : i32
    %c0_i32_0 = arith.constant 0 : i32
    %c0_i32_1 = arith.constant 0 : i32
    return %arg0, %c0_i32, %c0_i32_0 : i32, i32, i32
  }
  func.func @transform_2(%arg0: i32) -> (i32, i32, i32) {
    %c0_i32 = arith.constant 0 : i32
    %c0_i32_0 = arith.constant 0 : i32
    %c0_i32_1 = arith.constant 0 : i32
    return %arg0, %c0_i32, %c0_i32_0 : i32, i32, i32
  }
  func.func @transform_3(%arg0: i32) -> (i32, i32, i32) {
    %c0_i32 = arith.constant 0 : i32
    %c0_i32_0 = arith.constant 0 : i32
    %c0_i32_1 = arith.constant 0 : i32
    return %arg0, %c0_i32, %c0_i32_0 : i32, i32, i32
  }
}

</mosaic_0001>

<bundles_post_ra>
// kernel: tpu_custom_call.1
= control target key start
LH: loop header
LB: loop body
LE: loop exit
PB: predicated region body
PF: predicated region fallthrough
CT: control target
= control target key end

     0   :  { %8 = vsyncpa [#allocation3], 0  ;;  %s1159_s0 = inlined_call_operand.hbm [shape: f32[2,16,64], index: 0, kind: input, shape index: {}]   ;;  %s1160_s1 = inlined_call_operand.hbm [shape: f32[2,16,64], index: 1, kind: input, shape index: {}]   ;;  %s1161_s2 = inlined_call_operand.hbm [shape: f32[2,16,64], index: 2, kind: input, shape index: {}]   ;;  %s1162_s3 = inlined_call_operand.vmem [shape: f32[2,14,56], index: 3, kind: output, shape index: {}]  }
   0x1   :  { %10 = vsyncpa [#allocation3 + $0x1], 0 }
   0x2   :  { %11 = vsyncpa [#allocation5], 0 }
   0x3   :  { %13 = vsyncpa [#allocation5 + $0x1], 0  ;;  %s927_s12 = smov 0   ;;  %s929_s13 = smov 0  }
   0x4   :  { %s931_s14 = smov 0   ;;  %s933_s15 = smov 0  }
   0x5 LB: > { %s946_s16 = sadd.s32 4294967295, %s901_s15   ;;  %s949_s17 = sadd.s32 1, %s901_s15   ;;  %s901_s15 = sphi %s933_s15, %s1169_s15   ;;  %s897_s14 = sphi %s931_s14, %s1168_s14   ;;  %s893_s13 = sphi %s929_s13, %s1167_s13   ;;  %s889_s12 = sphi %s927_s12, %s1166_s12  }
   0x6   : > { %s23_s18 = ssub.s32 %s901_s15, %s949_s17  ;;  %s26_s19 = sadd.s32 1, %s897_s14 }
   0x7   : > { %p24_p0 = scmp.eq.s32.totalorder %s23_s18, 0  ;;  %p33_p1 = scmp.ne.s32.totalorder %s897_s14, %s893_s13 }
   0x8   : > { %p34_p2 = scmp.eq.s32.totalorder %s901_s15, 0  ;;  %p39_p3 = scmp.ne.s32.totalorder %s893_s13, %s889_s12 }
   0x9   : > { %s959_s20 = scalar_select %p24_p0, %s897_s14, %s26_s19  }
   0xa   : > { %p35_p4 = por %p34_p2, %p33_p1  ;;  %p40_p5 = scmp.eq.s32.totalorder %s946_s16, 0 }
   0xb   : > { %p732_p6 = scmp.lt.s32.totalorder %s901_s15, 2  ;;  %s141_s22 = sand.u32 1, %s897_s14  }
   0xc   : > { %p963_p7 = por %p40_p5, %p39_p3  ;;  %s970_s23 = sshll.u32 %s141_s22, 4 }
   0xd   : > { %s973_s24 = sshll.u32 %s901_s15, 4  ;;  %p975_p8 = pnand %p732_p6, %p35_p4 }
   0xe   : > { %s163_s26 = sand.u32 1, %s901_s15   ;;  %s172_s29 = scalar_lea.hbm %s1160_s1, %s973_s24 }
   0xf   : > { %s173_s30 = sshll.u32 %s172_s29, 4  ;;  %s167_s4 = scalar_lea.vmem [#allocation4], %s970_s23  ;;  %s174_s30 = int_to_ptr.hbm [resolvable:$true] %s173_s30 }
  0x10   : > { %s175_s5 = sshll.u32 %s167_s4, 4  ;;  %s985_s6 = scalar_lea.sflag [#allocation5], %s163_s26  ;;  %s176_s5 = int_to_ptr.vmem [resolvable:$true] %s175_s5 }
  0x11   : > { %s773_s7 = sshra.s32 %s174_s30, 4  ;;  %p777_p10 = pneg %p975_p8  ;;  %s774_s7 = int_to_ptr.hbm [resolvable:$true] %s773_s7 }
  0x12   : > { %s775_s8 = scalar_lea.hbm %s774_s7, 16  ;;  %s780_s11 = scalar_lea.hbm %s1160_s1, 32 }
  0x13   : > { %p776_p9 = scmp.ne.s32.totalorder %s774_s7, %s775_s8  ;;  %p781_p13 = scmp.lt.s32.totalorder %s774_s7, %s1160_s1 }
  0x14   : > { %p782_p0 = scmp.lt.s32.totalorder %s780_s11, %s775_s8 }
  0x15   : > { %p778_p11 = pnand %p777_p10, %p776_p9 }
  0x16   : > { %p783_p1 = por %p782_p0, %p781_p13 }
  0x17   : > { %p779_p12 = pneg %p778_p11 }
  0x19   : > { %p784_p2 = pnand %p783_p1, %p779_p12 }
  0x1b   : > { %787 = shalt.err (!%p784_p2)
}
  0x1c   : > { %s903_s19 = smov 128   ;;  %s904_s26 = smov 8  }
  0x1d   : > { %728 = dma.hbm_to_vmem [thread:$0]  (!%p975_p8), %s174_s30, 256, %s176_s5, %s985_s6, %s903_s19, %s903_s19, %s904_s26  }
  0x1e   : > { %p704_p3 = scmp.ge.s32.totalorder %s901_s15, 1  ;;  %p205_p4 = scmp.lt.s32.totalorder %s901_s15, 3 }
  0x1f   : > { %s150_s4 = scalar_lea.hbm %s1159_s0, %s973_s24  ;;  %s145_s8 = scalar_lea.vmem [#allocation2], %s970_s23 }
  0x20   : > { %p1006_p5 = pnand %p704_p3, %p205_p4  ;;  %s151_s7 = sshll.u32 %s150_s4, 4  ;;  %s152_s7 = int_to_ptr.hbm [resolvable:$true] %s151_s7 }
  0x21   : > { %s153_s9 = sshll.u32 %s145_s8, 4  ;;  %s142_s10 = scalar_lea.sflag [#allocation3], %s141_s22  ;;  %s154_s9 = int_to_ptr.vmem [resolvable:$true] %s153_s9 }
  0x22   : > { %s803_s11 = sshra.s32 %s152_s7, 4  ;;  %s810_s12 = scalar_lea.hbm %s1159_s0, 32  ;;  %s804_s11 = int_to_ptr.hbm [resolvable:$true] %s803_s11 }
  0x23   : > { %s805_s30 = scalar_lea.hbm %s804_s11, 16  ;;  %p811_p12 = scmp.lt.s32.totalorder %s804_s11, %s1159_s0 }
  0x24   : > { %p806_p6 = scmp.ne.s32.totalorder %s804_s11, %s805_s30  ;;  %p812_p13 = scmp.lt.s32.totalorder %s810_s12, %s805_s30 }
  0x26   : > { %p808_p9 = pnand %p806_p6, %p777_p10  ;;  %p813_p0 = por %p812_p13, %p811_p12 }
  0x28   : > { %p809_p11 = pneg %p808_p9 }
  0x2a   : > { %p814_p1 = pnand %p813_p0, %p809_p11 }
  0x2c   : > { %817 = shalt.err (!%p814_p1)
}
  0x2d   : > { %725 = dma.hbm_to_vmem [thread:$0]  (!%p975_p8), %s152_s7, 256, %s154_s9, %s142_s10, %s903_s19, %s903_s19, %s904_s26  }
  0x2e   : > { %s194_s4 = scalar_lea.hbm %s1161_s2, %s973_s24  ;;  %s189_s15 = scalar_lea.vmem [#allocation6], %s970_s23 }
  0x2f   : > { %s195_s8 = sshll.u32 %s194_s4, 4  ;;  %s197_s11 = sshll.u32 %s189_s15, 4  ;;  %s196_s8 = int_to_ptr.hbm [resolvable:$true] %s195_s8  ;;  %s198_s11 = int_to_ptr.vmem [resolvable:$true] %s197_s11 }
  0x30   : > { %s833_s30 = sshra.s32 %s196_s8, 4  ;;  %s840_s7 = scalar_lea.hbm %s1161_s2, 32  ;;  %s834_s30 = int_to_ptr.hbm [resolvable:$true] %s833_s30 }
  0x31   : > { %s835_s5 = scalar_lea.hbm %s834_s30, 16  ;;  %p841_p6 = scmp.lt.s32.totalorder %s834_s30, %s1161_s2 }
  0x32   : > { %p836_p2 = scmp.ne.s32.totalorder %s834_s30, %s835_s5  ;;  %p842_p9 = scmp.lt.s32.totalorder %s840_s7, %s835_s5 }
  0x34   : > { %p838_p3 = pnand %p836_p2, %p777_p10  ;;  %p843_p11 = por %p842_p9, %p841_p6 }
  0x36   : > { %p839_p4 = pneg %p838_p3 }
  0x38   : > { %p844_p12 = pnand %p843_p11, %p839_p4 }
  0x3a   : > { %847 = shalt.err (!%p844_p12)
}
  0x3b   : > { %731 = dma.hbm_to_vmem [thread:$0]  (!%p975_p8), %s196_s8, 256, %s198_s11, %s985_s6, %s903_s19, %s903_s19, %s904_s26  }
  0x3c   : > { %209 = sbr.rel (%p1006_p5) target bundleno = 275 (0x113), region = 32  ;;  %s211_s23 = sand.u32 (!%p1006_p5), 1, %s893_s13  }
  0x3d   : > { %s1054_s24 = sshll.u32 (!%p1006_p5), %s211_s23, 4  ;;  %s212_s28 = scalar_lea.sflag (!%p1006_p5), [#allocation3], %s211_s23 }
  0x3e   : > { %s215_s22 = scalar_lea.vmem (!%p1006_p5), [#allocation2], %s1054_s24 }
  0x41   : > { %880 = dma.done.wait (%p963_p7), %s212_s28, 256  }
  0x42   : > { %882 = vsyncadd (%p963_p7), %s212_s28, 4294967040  ;;  %s221_s25 = sand.u32 1, %s946_s16   ;;  %s225_s19 = scalar_lea.vmem [#allocation4], %s1054_s24 }
  0x43   : > { %s222_s6 = scalar_lea.sflag [#allocation5], %s221_s25 }
  0x44   : > { %884 = dma.done.wait (%p963_p7), %s222_s6, 512  }
  0x45   : > { %886 = vsyncadd (%p963_p7), %s222_s6, 4294966784  ;;  %v276_v0 = vld [vmem:[%s225_s19] sm:$0xff]  ;;  %s905_s26 = smov 124   ;;  %s906_s27 = smov 120   ;;  %v277_v2 = vld [vmem:[%s225_s19 + $0x8] sm:$0xff]  ;;  %vm300_vm0 = vcmask 1046528  }
  0x46   : > { %v274_v1 = vld [vmem:[%s215_s22] sm:$0xff]  ;;  %320 = vrot.lane.b32.xlu1 %v276_v0, %s905_s26  ;;  %v275_v3 = vld [vmem:[%s215_s22 + $0x8] sm:$0xff]  ;;  %v396_v5 = vmul.f32 %v276_v0, %v276_v0  ;;  %v1076_v7 = vmul.f32 %v277_v2, %v277_v2  ;;  %s235_s21 = scalar_lea.vmem [#allocation6], %s1054_s24  ;;  %vm308_vm1 = vcmask 1045504   ;;  %p269_p7 = scmp.lt.s32.totalorder %s946_s16, 1  ;;  %vm580_vm10 = vcmask 455680  }
  0x47   : > { %282 = vrot.lane.b32.xlu0 %v274_v1, %s905_s26  ;;  %290 = vrot.lane.b32.xlu2 %v274_v1, %s906_s27  ;;  %v354_v4 = vmul.f32 %v274_v1, %v274_v1  ;;  %v355_v6 = vmul.f32 %v275_v3, %v275_v3  ;;  %v1085_v8 = vmul.f32 %v276_v0, %v274_v1  ;;  %v1100_v10 = vld [vmem:[%s235_s21] sm:$0xff]  ;;  %v1104_v11 = vld [vmem:[%s235_s21 + $0x8] sm:$0xff]  ;;  %vm578_vm11 = vcmask 457728  }
  0x48   : > { %v1087_v9 = vmul.f32 %v277_v2, %v275_v3  ;;  %s1171_s16 = smov (!%p269_p7, %s946_s16), 1 }
  0x49   : > { %s715_s29 = sshll.u32 %s1171_s16, 4 }
  0x4a   : > { %s273_s15 = scalar_lea.vmem %s1162_s3, %s715_s29 }
  0x4e   : > { %322 = vrot.lane.b32.xlu1 %v277_v2, %s905_s26 }
  0x4f   : > { %284 = vrot.lane.b32.xlu0 %v275_v3, %s905_s26  ;;  %292 = vrot.lane.b32.xlu2 %v275_v3, %s906_s27 }
  0x56   : > { %330 = vrot.lane.b32.xlu1 %v277_v2, %s906_s27 }
  0x57   : > { %328 = vrot.lane.b32.xlu0 %v276_v0, %s906_s27  ;;  %358 = vrot.lane.b32.xlu2 %v354_v4, %s905_s26 }
  0x5e   : > { %400 = vrot.lane.b32.xlu1 %v396_v5, %s905_s26 }
  0x5f   : > { %360 = vrot.lane.b32.xlu0 %v355_v6, %s905_s26  ;;  %402 = vrot.lane.b32.xlu2 %v1076_v7, %s905_s26 }
  0x66   : > { %368 = vrot.lane.b32.xlu1 %v355_v6, %s906_s27 }
  0x67   : > { %366 = vrot.lane.b32.xlu0 %v354_v4, %s906_s27  ;;  %408 = vrot.lane.b32.xlu2 %v396_v5, %s906_s27 }
  0x6e   : > { %442 = vrot.lane.b32.xlu1 %v1085_v8, %s905_s26 }
  0x6f   : > { %410 = vrot.lane.b32.xlu0 %v1076_v7, %s906_s27  ;;  %444 = vrot.lane.b32.xlu2 %v1087_v9, %s905_s26 }
  0x76   : > { %452 = vrot.lane.b32.xlu1 %v1087_v9, %s906_s27 }
  0x77   : > { %450 = vrot.lane.b32.xlu0 %v1085_v8, %s906_s27  ;;  %504 = vrot.lane.b32.xlu2 %v1100_v10, %s905_s26 }
  0x7e   : > { %512 = vrot.lane.b32.xlu1 %v1100_v10, %s906_s27 }
  0x7f   : > { %506 = vrot.lane.b32.xlu0 %v1104_v11, %s905_s26  ;;  %514 = vrot.lane.b32.xlu2 %v1104_v11, %s906_s27 }
  0xa1   : > { %v291_v12 = vpop.permute.xlu2 %290 }
  0xa9   : > { %v293_v15 = vpop.permute.xlu2 %292 }
  0xb1   : > { %v359_v18 = vpop.permute.xlu2 %358 }
  0xb2   : > { %v364_v35 = vadd.f32 %v359_v18, %v354_v4 }
  0xb8   : > { %v321_v13 = vpop.permute.xlu1 %320 }
  0xb9   : > { %v283_v14 = vpop.permute.xlu0 %282  ;;  %v326_v23 = vadd.f32 %v321_v13, %v276_v0  ;;  %v403_v24 = vpop.permute.xlu2 %402 }
  0xba   : > { %v288_v25 = vadd.f32 %v283_v14, %v274_v1  ;;  %v407_v54 = vadd.f32 %v403_v24, %v1076_v7 }
  0xbc   : > { %v296_v31 = vadd.f32 %v291_v12, %v288_v25 }
  0xbe   : > { %v301_v37 = vrot.slane %v296_v31, 1  ;;  %v309_v56 = vrot.slane %v296_v31, 2 }
  0xc0   : > { %v323_v16 = vpop.permute.xlu1 %322 }
  0xc1   : > { %v285_v17 = vpop.permute.xlu0 %284  ;;  %v327_v21 = vadd.f32 %v323_v16, %v277_v2  ;;  %v409_v43 = vpop.permute.xlu2 %408 }
  0xc2   : > { %v289_v22 = vadd.f32 %v285_v17, %v275_v3 }
  0xc4   : > { %v297_v30 = vadd.f32 %v293_v15, %v289_v22 }
  0xc6   : > { %v302_v34 = vrot.slane %v297_v30, 1  ;;  %v310_v53 = vrot.slane %v297_v30, 2 }
  0xc8   : > { %v331_v19 = vpop.permute.xlu1 %330  ;;  %v303_v44 = vsel %vm300_vm0, %v301_v37, %v302_v34  ;;  %v307_v51 = vadd.f32 %v302_v34, %v297_v30 }
  0xc9   : > { %v329_v20 = vpop.permute.xlu0 %328  ;;  %v335_v28 = vadd.f32 %v331_v19, %v327_v21  ;;  %v306_v57 = vadd.f32 %v303_v44, %v296_v31  ;;  %v445_v7 = vpop.permute.xlu2 %444 }
  0xca   : > { %v334_v29 = vadd.f32 %v329_v20, %v326_v23  ;;  %v315_v0 = vadd.f32 %v310_v53, %v307_v51  ;;  %v449_v22 = vadd.f32 %v445_v7, %v1087_v9 }
  0xcb   : > { %v339_v32 = vrot.slane %v335_v28, 1  ;;  %v346_v46 = vrot.slane %v335_v28, 2 }
  0xcc   : > { %v338_v33 = vrot.slane %v334_v29, 1  ;;  %v345_v47 = vrot.slane %v334_v29, 2  ;;  %v317_v19 = vmul.f32 0.11111111, %v315_v0 }
  0xcd   : > { %v344_v45 = vadd.f32 %v339_v32, %v335_v28 }
  0xce   : > { %v340_v40 = vsel %vm300_vm0, %v338_v33, %v339_v32  ;;  %v347_v60 = vsel %vm308_vm1, %v345_v47, %v346_v46  ;;  %v393_v34 = vmul.f32 %v317_v19, %v317_v19 }
  0xcf   : > { %v343_v52 = vadd.f32 %v340_v40, %v334_v29  ;;  %v351_v58 = vadd.f32 %v346_v46, %v344_v45 }
  0xd0   : > { %v401_v26 = vpop.permute.xlu1 %400 }
  0xd1   : > { %v361_v27 = vpop.permute.xlu0 %360  ;;  %v406_v48 = vadd.f32 %v401_v26, %v396_v5  ;;  %v350_v1 = vadd.f32 %v347_v60, %v343_v52  ;;  %v311_v5 = vsel %vm308_vm1, %v309_v56, %v310_v53  ;;  %v1118_v13 = vmul.f32 0.11111111, %v351_v58 }
  0xd2   : > { %v365_v36 = vadd.f32 %v361_v27, %v355_v6  ;;  %v314_v12 = vadd.f32 %v311_v5, %v306_v57 }
  0xd3   : > { %v414_v63 = vadd.f32 %v409_v43, %v406_v48  ;;  %v1121_v20 = vmul.f32 0.11111111, %v350_v1  ;;  %v435_v29 = vmul.f32 %v1118_v13, %v1118_v13 }
  0xd4   : > { %v316_v27 = vmul.f32 0.11111111, %v314_v12 }
  0xd5   : > { %v418_v16 = vrot.slane %v414_v63, 1  ;;  %v425_v23 = vrot.slane %v414_v63, 2  ;;  %v434_v33 = vmul.f32 %v1121_v20, %v1121_v20 }
  0xd6   : > { %v476_v12 = vmul.f32 %v1121_v20, %v316_v27 }
  0xd8   : > { %v369_v38 = vpop.permute.xlu1 %368 }
  0xd9   : > { %v367_v39 = vpop.permute.xlu0 %366  ;;  %v373_v41 = vadd.f32 %v369_v38, %v365_v36 }
  0xda   : > { %v372_v42 = vadd.f32 %v367_v39, %v364_v35 }
  0xdb   : > { %v377_v49 = vrot.slane %v373_v41, 1  ;;  %v384_v61 = vrot.slane %v373_v41, 2 }
  0xdc   : > { %v376_v50 = vrot.slane %v372_v42, 1  ;;  %v383_v62 = vrot.slane %v372_v42, 2 }
  0xdd   : > { %v382_v59 = vadd.f32 %v377_v49, %v373_v41  ;;  %v392_v41 = vmul.f32 %v316_v27, %v316_v27 }
  0xde   : > { %v378_v55 = vsel %vm300_vm0, %v376_v50, %v377_v49  ;;  %v385_v15 = vsel %vm308_vm1, %v383_v62, %v384_v61 }
  0xdf   : > { %v381_v2 = vadd.f32 %v378_v55, %v372_v42  ;;  %v389_v14 = vadd.f32 %v384_v61, %v382_v59  ;;  %v493_v42 = vadd.f32 %v435_v29, %v393_v34  ;;  %v492_v48 = vadd.f32 %v434_v33, %v392_v41  ;;  %v505_v55 = vpop.permute.xlu2 %504 }
  0xe0   : > { %v443_v3 = vpop.permute.xlu1 %442  ;;  %v510_v7 = vadd.f32 %v505_v55, %v1100_v10 }
  0xe1   : > { %v411_v4 = vpop.permute.xlu0 %410  ;;  %v388_v21 = vadd.f32 %v385_v15, %v381_v2  ;;  %v448_v24 = vadd.f32 %v443_v3, %v1085_v8  ;;  %v391_v28 = vmul.f32 0.11111111, %v389_v14  ;;  %v495_v59 = vadd.f32 0.0001, %v493_v42 }
  0xe2   : > { %v415_v6 = vadd.f32 %v411_v4, %v407_v54  ;;  %v494_v62 = vadd.f32 0.0001, %v492_v48  ;;  %v481_v15 = vmul.f32 2.0, %v317_v19 }
  0xe3   : > { %v390_v9 = vmul.f32 0.11111111, %v388_v21  ;;  %v395_v40 = vsub.f32 %v391_v28, %v393_v34 }
  0xe4   : > { %v419_v17 = vrot.slane %v415_v6, 1  ;;  %v426_v18 = vrot.slane %v415_v6, 2 }
  0xe5   : > { %v394_v49 = vsub.f32 %v390_v9, %v392_v41 }
  0xe6   : > { %v420_v25 = vsel %vm300_vm0, %v418_v16, %v419_v17  ;;  %v424_v26 = vadd.f32 %v419_v17, %v415_v6  ;;  %v427_v31 = vsel %vm308_vm1, %v425_v23, %v426_v18  ;;  %v477_v6 = vmul.f32 %v1118_v13, %v317_v19 }
  0xe7   : > { %v423_v30 = vadd.f32 %v420_v25, %v414_v63  ;;  %v480_v16 = vmul.f32 2.0, %v316_v27  ;;  %v483_v23 = vmul.f32 %v481_v15, %v1118_v13 }
  0xe8   : > { %v431_v32 = vadd.f32 %v426_v18, %v424_v26  ;;  %v453_v36 = vpop.permute.xlu1 %452 }
  0xe9   : > { %v430_v35 = vadd.f32 %v427_v31, %v423_v30  ;;  %v451_v8 = vpop.permute.xlu0 %450  ;;  %v457_v38 = vadd.f32 %v453_v36, %v449_v22  ;;  %v515_v22 = vpop.permute.xlu2 %514 }
  0xea   : > { %v433_v37 = vmul.f32 0.11111111, %v431_v32  ;;  %v456_v39 = vadd.f32 %v451_v8, %v448_v24  ;;  %v482_v24 = vmul.f32 %v480_v16, %v1121_v20 }
  0xeb   : > { %v432_v43 = vmul.f32 0.11111111, %v430_v35  ;;  %v461_v45 = vrot.slane %v457_v38, 1  ;;  %v468_v46 = vrot.slane %v457_v38, 2 }
  0xec   : > { %v437_v44 = vsub.f32 %v433_v37, %v435_v29  ;;  %v460_v47 = vrot.slane %v456_v39, 1  ;;  %v467_v51 = vrot.slane %v456_v39, 2  ;;  %v484_v19 = vadd.f32 0.0001, %v482_v24 }
  0xed   : > { %v436_v50 = vsub.f32 %v432_v43, %v434_v33  ;;  %v466_v53 = vadd.f32 %v461_v45, %v457_v38  ;;  %v485_v33 = vadd.f32 0.0001, %v483_v23 }
  0xee   : > { %v497_v52 = vadd.f32 %v437_v44, %v395_v40  ;;  %v462_v54 = vsel %vm300_vm0, %v460_v47, %v461_v45  ;;  %v469_v58 = vsel %vm308_vm1, %v467_v51, %v468_v46 }
  0xef   : > { %v496_v56 = vadd.f32 %v436_v50, %v394_v49  ;;  %v465_v57 = vadd.f32 %v462_v54, %v456_v39  ;;  %v473_v61 = vadd.f32 %v468_v46, %v466_v53 }
  0xf0   : > { %v499_v60 = vadd.f32 0.0009, %v497_v52  ;;  %v513_v14 = vpop.permute.xlu1 %512 }
  0xf1   : > { %v498_v63 = vadd.f32 0.0009, %v496_v56  ;;  %v472_v0 = vadd.f32 %v469_v58, %v465_v57  ;;  %v475_v3 = vmul.f32 0.11111111, %v473_v61  ;;  %v507_v5 = vpop.permute.xlu0 %506  ;;  %v518_v25 = vadd.f32 %v513_v14, %v510_v7 }
  0xf2   : > { %v501_v1 = vmul.f32 %v499_v60, %v495_v59  ;;  %v511_v18 = vadd.f32 %v507_v5, %v1104_v11 }
  0xf3   : > { %v500_v2 = vmul.f32 %v498_v63, %v494_v62  ;;  %v474_v4 = vmul.f32 0.11111111, %v472_v0  ;;  %v479_v17 = vsub.f32 %v475_v3, %v477_v6  ;;  %v522_v27 = vrot.slane %v518_v25, 1 }
  0xf4   : > { %769 = vrcp.f32 %v501_v1  ;;  %v519_v10 = vadd.f32 %v515_v22, %v511_v18  ;;  %v561_v35 = vand.u32 2147483647, %v501_v1  ;;  %v563_v36 = vand.u32 2147483648, %v501_v1 }
  0xf5   : > { %771 = vrcp.f32 %v500_v2  ;;  %v478_v21 = vsub.f32 %v474_v4, %v476_v12  ;;  %v487_v29 = vmul.f32 2.0, %v479_v17  ;;  %v549_v11 = vand.u32 2147483648, %v500_v2 }
  0xf6   : > { %v523_v20 = vrot.slane %v519_v10, 1  ;;  %v547_v39 = vand.u32 2147483647, %v500_v2  ;;  %vm543_vm4 = vweird.f32 %v500_v2  ;;  %v529_v40 = vrot.slane %v518_v25, 2 }
  0xf7   : > { %v486_v31 = vmul.f32 2.0, %v478_v21  ;;  %v489_v8 = vadd.f32 0.0009, %v487_v29  ;;  %vm557_vm5 = vweird.f32 %v501_v1  ;;  %v550_v43 = vor.u32 1.1754944e-38, %v549_v11 }
  0xf8   : > { %vm562_vm7 = vcmp.eq.f32.partialorder %v561_v35, 8.507059e+37  ;;  %v564_v44 = vor.u32 1.1754944e-38, %v563_v36  ;;  %v524_v47 = vsel %vm300_vm0, %v522_v27, %v523_v20  ;;  %v530_v48 = vrot.slane %v519_v10, 2 }
  0xf9   : > { %v488_v37 = vadd.f32 0.0009, %v486_v31  ;;  %v491_v45 = vmul.f32 %v489_v8, %v485_v33  ;;  %vm548_vm9 = vcmp.eq.f32.partialorder %v547_v39, 8.507059e+37  ;;  %v528_v54 = vadd.f32 %v523_v20, %v519_v10 }
  0xfa   : > { %v770_v26 = vpop.eup %769  ;;  %v527_v56 = vadd.f32 %v524_v47, %v518_v25  ;;  %v531_v58 = vsel %vm308_vm1, %v529_v40, %v530_v48 }
  0xfb   : > { %v772_v28 = vpop.eup %771  ;;  %v553_v30 = vmul.f32 %v770_v26, %v501_v1  ;;  %vm558_vm2 = vweird.f32 %v770_v26  ;;  %v490_v49 = vmul.f32 %v488_v37, %v484_v19  ;;  %v535_v61 = vadd.f32 %v530_v48, %v528_v54 }
  0xfc   : > { %v539_v32 = vmul.f32 %v772_v28, %v500_v2  ;;  %vm544_vm3 = vweird.f32 %v772_v28  ;;  %vm559_vm6 = vmor %vm557_vm5, %vm558_vm2  ;;  %v534_v63 = vadd.f32 %v531_v58, %v527_v56 }
  0xfd   : > { %v554_v34 = vsub.f32 1.0, %v553_v30  ;;  %vm545_vm8 = vmor %vm543_vm4, %vm544_vm3  ;;  %v537_v3 = vmul.f32 0.11111111, %v535_v61 }
  0xfe   : > { %v540_v9 = vsub.f32 1.0, %v539_v32  ;;  %v536_v5 = vmul.f32 0.11111111, %v534_v63 }
  0xff   : > { %v555_v13 = vmul.f32 %v770_v26, %v554_v34 }
 0x100   : > { %v541_v38 = vmul.f32 %v772_v28, %v540_v9 }
 0x101   : > { %v556_v41 = vadd.f32 %v770_v26, %v555_v13 }
 0x102   : > { %v542_v42 = vadd.f32 %v772_v28, %v541_v38 }
 0x103   : > { %v560_v46 = vsel %vm559_vm6, %v770_v26, %v556_v41 }
 0x104   : > { %v546_v50 = vsel %vm545_vm8, %v772_v28, %v542_v42  ;;  %v565_v51 = vsel %vm562_vm7, %v564_v44, %v560_v46 }
 0x105   : > { %v551_v52 = vsel %vm548_vm9, %v550_v43, %v546_v50  ;;  %v567_v53 = vmul.f32 %v565_v51, %v491_v45 }
 0x106   : > { %v566_v55 = vmul.f32 %v551_v52, %v490_v49 }
 0x107   : > { %v569_v57 = vsub.f32 1.0, %v567_v53 }
 0x108   : > { %v568_v59 = vsub.f32 1.0, %v566_v55 }
 0x109   : > { %v571_v60 = vmul.f32 0.5, %v569_v57 }
 0x10a   : > { %v570_v62 = vmul.f32 0.5, %v568_v59 }
 0x10b   : > { %v573_v0 = vmax.f32 %v571_v60, 0.0 }
 0x10c   : > { %v572_v1 = vmax.f32 %v570_v62, 0.0 }
 0x10d   : > { %v575_v2 = vmin.f32 %v573_v0, 1.0 }
 0x10e   : > { %v574_v4 = vmin.f32 %v572_v1, 1.0 }
 0x10f   : > { %v577_v6 = vmul.f32 %v575_v2, %v537_v3 }
 0x110   : > { %v576_v7 = vmul.f32 %v574_v4, %v536_v5 }
 0x111   : > { %581 = vst.msk [vmem:[%s273_s15 + $0x8] sm:$0x3f] %vm580_vm10, %v577_v6 }
 0x112   : > { %579 = vst.msk [vmem:[%s273_s15] sm:$0xff] %vm578_vm11, %v576_v7 }
 0x113 PF: > { %p16_p8 = scmp.ge.s32.totalorder %s949_s17, 4   ;;  %s1166_s12 = smov %s893_s13 }
 0x114   : > { %s1167_s13 = smov %s897_s14  ;;  %s1168_s14 = smov %s959_s20 }
 0x115   : > { %s1169_s15 = smov %s949_s17  ;;  %18 = sbr.rel (!%p16_p8) target bundleno = 5 (0x5), region = 96 }
 0x11a   :  { %603 = vsyncpa [#allocation3], 1 }
 0x11b   :  { %605 = vsyncpa [#allocation3 + $0x1], 1 }
 0x11c   :  { %606 = vsyncpa [#allocation5], 1 }
 0x11d   :  { %608 = vsyncpa [#allocation5 + $0x1], 1 }

</bundles_post_ra>
